<compile_context>
chip_gen: v7x
topology: tpu7x:2x2x1
jax: 0.10.0
libtpu: 0.0.40
codegen_flags: <defaults>
</compile_context>

<pallas_src>
import jax
import jax.numpy as jnp
from jax.experimental import pallas as pl
from jax.experimental.pallas import tpu as pltpu


def _round_up(v, m):
    return (v + m - 1) // m * m


def _pick_token_tile(N, C, hidden_p, itemsize):
    """Largest 128-multiple tile dividing N whose pipelined footprint fits VMEM."""
    budget = 40 << 20  # leave headroom below the v7x 64 MiB physical VMEM
    c_pad = _round_up(C, 8)
    for tn in (2048, 1024, 512, 256, 128):
        if N % tn:
            continue
        x_tile = c_pad * tn * itemsize
        out_tile = tn * hidden_p * itemsize
        f32_tmp = tn * hidden_p * 4
        if 2 * (x_tile + out_tile) + f32_tmp <= budget:
            return tn
    if N % 128 == 0:
        return 128
    return N  # full-extent block is always a legal BlockSpec


def _segformer_mlp_kernel(x_ref, w_ref, b_ref, o_ref):
    # x_ref: (1, C, TN)   w_ref: (hidden_p, C)   b_ref: (1, hidden_p)
    # o_ref: (1, TN, hidden_p)
    x = x_ref[0]            # (C, TN)
    w = w_ref[...]          # (hidden_p, C)
    # y = x^T @ w^T : contract lhs dim 0 (C) with rhs dim 1 (C) -> (TN, hidden_p).
    # Mosaic drives this as a transposed-operand MXU matmul; accumulate in f32.
    y = jax.lax.dot_general(
        x, w,
        dimension_numbers=(((0,), (1,)), ((), ())),
        preferred_element_type=jnp.float32,
    )
    y = y + b_ref[...].astype(jnp.float32)     # bias broadcast over tokens (f32)
    o_ref[0] = y.astype(o_ref.dtype)           # single lane-dense store


def segformer_mlp(x_nchw, weight, bias, *, token_tile=None):
    """x_nchw: (B, C, H, W); weight: (hidden, C); bias: (hidden,) -> (B, H*W, hidden)."""
    B, C, H, W = x_nchw.shape
    hidden = weight.shape[0]
    N = H * W
    dtype = x_nchw.dtype
    itemsize = jnp.dtype(dtype).itemsize

    # Free, contiguous reshape (no HBM pass): NCHW -> (B, C, N).
    x_cn = x_nchw.reshape(B, C, N)

    # Pad hidden to a multiple of 128 so output stores are unmasked / lane-dense.
    hidden_p = _round_up(hidden, 128)
    if hidden_p != hidden:
        weight = jnp.pad(weight, ((0, hidden_p - hidden), (0, 0)))
        bias = jnp.pad(bias, ((0, hidden_p - hidden),))
    b2 = bias.reshape(1, hidden_p)

    TN = token_tile if token_tile is not None else _pick_token_tile(
        N, C, hidden_p, itemsize)
    assert N % TN == 0, (N, TN)
    grid = (B, N // TN)

    # VMEM budget: double-buffered x/out tiles + resident weight/bias + headroom
    # for the f32 intermediate. Clamped to [32 MiB, 64 MiB] (v7x-safe).
    x_tile = _round_up(C, 8) * _round_up(TN, 128) * itemsize
    out_tile = _round_up(TN, 8) * hidden_p * itemsize
    w_bytes = _round_up(hidden_p, 8) * _round_up(C, 128) * itemsize
    b_bytes = 8 * hidden_p * itemsize
    needed = 2 * (x_tile + out_tile) + 2 * (w_bytes + b_bytes) + (8 << 20)
    vmem_limit = int(min(max(needed, 32 << 20), 64 << 20))

    cost = pl.CostEstimate(
        flops=2 * B * N * C * hidden_p,
        transcendentals=0,
        bytes_accessed=(x_cn.size + weight.size + bias.size + B * N * hidden_p)
        * itemsize,
    )

    out = pl.pallas_call(
        _segformer_mlp_kernel,
        out_shape=jax.ShapeDtypeStruct((B, N, hidden_p), dtype),
        grid_spec=pltpu.PrefetchScalarGridSpec(
            num_scalar_prefetch=0,
            grid=grid,
            in_specs=[
                pl.BlockSpec((1, C, TN), lambda b, n: (b, 0, n)),       # x tile
                pl.BlockSpec((hidden_p, C), lambda b, n: (0, 0)),       # weight (resident)
                pl.BlockSpec((1, hidden_p), lambda b, n: (0, 0)),       # bias   (resident)
            ],
            out_specs=pl.BlockSpec((1, TN, hidden_p), lambda b, n: (b, n, 0)),
        ),
        compiler_params=pltpu.CompilerParams(
            dimension_semantics=("parallel", "parallel"),
            vmem_limit_bytes=vmem_limit,
        ),
        cost_estimate=cost,
    )(x_cn, weight, b2)

    if hidden_p != hidden:
        out = out[..., :hidden]
    return out


if __name__ == "__main__":
    key = jax.random.PRNGKey(0)
    # Small but representative shapes (Segformer stage-1 input_dim is 32).
    B, C, H, W = 2, 32, 16, 16
    hidden = 32

    k_x, k_w, k_b = jax.random.split(key, 3)
    x = jax.random.normal(k_x, (B, C, H, W), dtype=jnp.float32)
    # Deterministic parameter init (mimics nn.Linear uniform(-1/sqrt(C), 1/sqrt(C)))
    bound = 1.0 / (C ** 0.5)
    weight = jax.random.uniform(k_w, (hidden, C), minval=-bound, maxval=bound,
                                dtype=jnp.float32)
    bias = jax.random.uniform(k_b, (hidden,), minval=-bound, maxval=bound,
                              dtype=jnp.float32)

    y = segformer_mlp(x, weight, bias)
    y = jax.block_until_ready(y)

    # Reference check in plain JAX (matches the PyTorch module's forward).
    x_tok = jnp.transpose(x.reshape(B, C, H * W), (0, 2, 1))
    y_ref = x_tok @ weight.T + bias
    assert y.shape == (B, H * W, hidden), y.shape
    assert bool(jnp.allclose(y, y_ref, atol=1e-5, rtol=1e-5)), "mismatch vs reference"

    print("KERNEL_OK")
</pallas_src>

<mosaic_0001>
module attributes {stable_mosaic.version = 11 : i64} {
  func.func @_segformer_mlp_kernel(%arg0: i32, %arg1: i32, %arg2: memref<1x32x256xf32, #tpu.memory_space<vmem>>, %arg3: memref<128x32xf32, #tpu.memory_space<vmem>>, %arg4: memref<1x128xf32, #tpu.memory_space<vmem>>, %arg5: memref<1x256x128xf32, #tpu.memory_space<vmem>>) attributes {dimension_semantics = [#tpu.dimension_semantics<parallel>, #tpu.dimension_semantics<parallel>], iteration_bounds = array<i64: 2, 1>, scalar_prefetch = 0 : i64, scratch_operands = 0 : i64, tpu.core_type = #tpu.core_type<tc>, window_params = [{transform_indices = @transform_0, window_bounds = array<i64: 1, 32, 256>}, {pipeline_mode = #tpu.pipeline_mode<synchronous>, transform_indices = @transform_1, window_bounds = array<i64: 128, 32>}, {pipeline_mode = #tpu.pipeline_mode<synchronous>, transform_indices = @transform_2, window_bounds = array<i64: 1, 128>}, {transform_indices = @transform_3, window_bounds = array<i64: 1, 256, 128>}]} {
    %c0 = arith.constant 0 : index
    %c0_0 = arith.constant 0 : index
    %c0_1 = arith.constant 0 : index
    %0 = vector.load %arg2[%c0, %c0_0, %c0_1] : memref<1x32x256xf32, #tpu.memory_space<vmem>>, vector<1x32x256xf32>
    %1 = vector.shape_cast %0 : vector<1x32x256xf32> to vector<32x256xf32>
    %c0_2 = arith.constant 0 : index
    %c0_3 = arith.constant 0 : index
    %2 = vector.load %arg3[%c0_2, %c0_3] : memref<128x32xf32, #tpu.memory_space<vmem>>, vector<128x32xf32>
    %cst = arith.constant dense<0.000000e+00> : vector<256x128xf32>
    %3 = tpu.matmul %1, %2, %cst {dimension_numbers = #tpu.dot_dimension_numbers<[0], [1], [1], [0], [0, 1, 1, 0], [], []>} : vector<32x256xf32>, vector<128x32xf32>, vector<256x128xf32> -> vector<256x128xf32>
    %c0_4 = arith.constant 0 : index
    %c0_5 = arith.constant 0 : index
    %4 = vector.load %arg4[%c0_4, %c0_5] : memref<1x128xf32, #tpu.memory_space<vmem>>, vector<1x128xf32>
    %5 = vector.broadcast %4 : vector<1x128xf32> to vector<256x128xf32>
    %6 = arith.addf %3, %5 : vector<256x128xf32>
    %c0_6 = arith.constant 0 : index
    %c0_7 = arith.constant 0 : index
    %c0_8 = arith.constant 0 : index
    %7 = vector.load %arg5[%c0_6, %c0_7, %c0_8] : memref<1x256x128xf32, #tpu.memory_space<vmem>>, vector<1x256x128xf32>
    %8 = vector.shape_cast %7 : vector<1x256x128xf32> to vector<256x128xf32>
    %9 = vector.shape_cast %6 : vector<256x128xf32> to vector<1x256x128xf32>
    tpu.vector_store %arg5[%c0_6, %c0_7, %c0_8], %9 {strides = array<i32>} : memref<1x256x128xf32, #tpu.memory_space<vmem>>, vector<1x256x128xf32>,
    return
  }
  func.func @transform_0(%arg0: i32, %arg1: i32) -> (i32, i32, i32) {
    %c0_i32 = arith.constant 0 : i32
    %c0_i32_0 = arith.constant 0 : i32
    return %arg0, %c0_i32, %arg1 : i32, i32, i32
  }
  func.func @transform_1(%arg0: i32, %arg1: i32) -> (i32, i32) {
    %c0_i32 = arith.constant 0 : i32
    %c0_i32_0 = arith.constant 0 : i32
    %c0_i32_1 = arith.constant 0 : i32
    return %c0_i32, %c0_i32_0 : i32, i32
  }
  func.func @transform_2(%arg0: i32, %arg1: i32) -> (i32, i32) {
    %c0_i32 = arith.constant 0 : i32
    %c0_i32_0 = arith.constant 0 : i32
    %c0_i32_1 = arith.constant 0 : i32
    return %c0_i32, %c0_i32_0 : i32, i32
  }
  func.func @transform_3(%arg0: i32, %arg1: i32) -> (i32, i32, i32) {
    %c0_i32 = arith.constant 0 : i32
    %c0_i32_0 = arith.constant 0 : i32
    return %arg0, %arg1, %c0_i32 : i32, i32, i32
  }
}

</mosaic_0001>

<bundles_post_ra>
// kernel: tpu_custom_call.1
= control target key start
LH: loop header
LB: loop body
LE: loop exit
PB: predicated region body
PF: predicated region fallthrough
CT: control target
= control target key end

     0   :  { %8 = vsyncpa [#allocation3], 0  ;;  %s1550_s0 = inlined_call_operand.vmem [shape: f32[2,32,256], index: 0, kind: input, shape index: {}]   ;;  %s1551_s1 = inlined_call_operand.vmem [shape: f32[128,32], index: 1, kind: input, shape index: {}]   ;;  %s1552_s2 = inlined_call_operand.vmem [shape: f32[1,128], index: 2, kind: input, shape index: {}]   ;;  %s1553_s3 = inlined_call_operand.hbm [shape: f32[2,256,128], index: 3, kind: output, shape index: {}]  }
   0x1   :  { %10 = vsyncpa [#allocation3 + $0x1], 0  ;;  %s1209_s12 = smov 0   ;;  %s1211_s13 = smov 0  }
   0x2   :  { %s1213_s14 = smov 0   ;;  %s1215_s15 = smov 0  }
   0x3   :  { %s1217_s16 = smov 0   ;;  %s1219_s17 = smov 0  }
   0x4 LB: > { %s792_s18 = sadd.s32 4294967295, %s1184_s17   ;;  %s793_s19 = sadd.s32 4294967294, %s1184_s17   ;;  %s1184_s17 = sphi %s1219_s17, %s16_s17   ;;  %s1180_s16 = sphi %s1217_s16, %s1562_s16   ;;  %s1176_s15 = sphi %s1215_s15, %s1561_s15   ;;  %s1172_s14 = sphi %s1213_s14, %s1560_s14   ;;  %s1168_s13 = sphi %s1211_s13, %s1559_s13   ;;  %s1164_s12 = sphi %s1209_s12, %s1558_s12  }
   0x5   : > { %s28_s20 = sadd.s32 1, %s1180_s16  ;;  %s107_s21 = sadd.s32 1, %s1172_s14 }
   0x6   : > { %p30_p0 = scmp.ge.s32.totalorder %s28_s20, 2  ;;  %p117_p1 = scmp.ne.s32.totalorder %s1172_s14, %s1168_s13 }
   0x7   : > { %p118_p2 = scmp.eq.s32.totalorder %s792_s18, 1  ;;  %p123_p3 = scmp.ne.s32.totalorder %s1168_s13, %s1164_s12 }
   0x8   : > { %s1564_s20 = smov (%p30_p0, %s28_s20), 0  ;;  %p124_p5 = scmp.eq.s32.totalorder %s793_s19, 1 }
   0x9   : > { %p1249_p4 = por %p118_p2, %p117_p1  ;;  %s102_s23 = ssub.s32 %s1180_s16, %s1564_s20 }
   0xa   : > { %p796_p6 = scmp.ge.s32.totalorder %s1184_s17, 1  ;;  %p105_p7 = scmp.eq.s32.totalorder %s102_s23, 0 }
   0xb   : > { %p1256_p8 = por %p124_p5, %p123_p3  ;;  %p161_p9 = scmp.lt.s32.totalorder %s1184_s17, 3 }
   0xc   : > { %s1262_s25 = scalar_select %p105_p7, %s1172_s14, %s107_s21  }
   0xd   : > { %p162_p10 = pnand %p796_p6, %p161_p9 }
   0xe   : > { %p190_p11 = scmp.lt.s32.totalorder (!%p162_p10), %s1176_s15, 1  ;;  %v208_v0 = vld [vmem:[%s1551_s1] sm:$0xff] (!%p162_p10)  ;;  %v209_v1 = vld [vmem:[%s1551_s1 + $0x8] sm:$0xff] (!%p162_p10)  ;;  %vm295_vm0 = vcmask (!%p162_p10), 261120   ;;  %v210_v2 = vld [vmem:[%s1551_s1 + $0x10] sm:$0xff] (!%p162_p10)  ;;  %s186_s29 = sand.u32 (!%p162_p10), 1, %s1168_s13  }
   0xf   : > { %165 = sbr.rel (%p162_p10) target bundleno = 446 (0x1be), region = 32  ;;  %v984_v3 = vpack.c.bf16 (!%p162_p10), %v209_v1, %v208_v0  ;;  %vm1276_vm1 = vmpackc.low (!%p162_p10), %vm295_vm0, %vm295_vm0  ;;  %v211_v5 = vld [vmem:[%s1551_s1 + $0x18] sm:$0xff] (!%p162_p10)  ;;  %v212_v7 = vld [vmem:[%s1551_s1 + $0x20] sm:$0xff] (!%p162_p10)  ;;  %s797_s30 = sshll.u32 (!%p162_p10), %s186_s29, 8 }
  0x10   : > { %v990_v6 = vpack.c.bf16 (!%p162_p10), %v211_v5, %v210_v2  ;;  %v213_v10 = vld [vmem:[%s1551_s1 + $0x28] sm:$0xff] (!%p162_p10)  ;;  %v214_v16 = vld [vmem:[%s1551_s1 + $0x30] sm:$0xff] (!%p162_p10)  ;;  %v215_v17 = vld [vmem:[%s1551_s1 + $0x38] sm:$0xff] (!%p162_p10)  ;;  %s1431_s6 = scalar_lea.vmem (!%p162_p10), [#allocation2], %s797_s30  ;;  %s1186_s19 = smov (!%p162_p10), [#allocation2]  }
  0x11   : > { %986 = vmatprep.subr.msk.bf16.mxu0 (!%p162_p10), %vm1276_vm1, %v984_v3  ;;  %1032 = vmatprep.subr.msk.bf16.mxu1 (!%p162_p10), %vm1276_vm1, %v984_v3  ;;  %v996_v13 = vpack.c.bf16 (!%p162_p10), %v213_v10, %v212_v7  ;;  %v1002_v20 = vpack.c.bf16 (!%p162_p10), %v215_v17, %v214_v16  ;;  %v216_v21 = vld [vmem:[%s1551_s1 + $0x40] sm:$0xff] (!%p162_p10)  ;;  %v217_v22 = vld [vmem:[%s1551_s1 + $0x48] sm:$0xff] (!%p162_p10)  ;;  %v218_v24 = vld [vmem:[%s1551_s1 + $0x50] sm:$0xff] (!%p162_p10)  ;;  %s1110_s21 = sshll.u32 (!%p162_p10), %s1186_s19, 4  ;;  %s1111_s21 = int_to_ptr.vmem [resolvable:$false] %s1110_s21 }
  0x12   : > { %989 = vmatpush3.bf16.xpose.msk.msra.mxu0 (!%p162_p10), %vm1276_vm1, %v984_v3  ;;  %1040 = vmatpush3.bf16.xpose.msk.msra.mxu1 (!%p162_p10), %vm1276_vm1, %v984_v3  ;;  %v1008_v23 = vpack.c.bf16 (!%p162_p10), %v217_v22, %v216_v21  ;;  %v219_v25 = vld [vmem:[%s1551_s1 + $0x58] sm:$0xff] (!%p162_p10)  ;;  %v220_v27 = vld [vmem:[%s1551_s1 + $0x60] sm:$0xff] (!%p162_p10)  ;;  %v221_v28 = vld [vmem:[%s1551_s1 + $0x68] sm:$0xff] (!%p162_p10)  ;;  %s1112_s23 = scalar_lea.vmem (!%p162_p10), %s1111_s21, 8192 }
  0x13   : > { %992 = vmatprep.subr.msk.bf16.mxu0 (!%p162_p10), %vm1276_vm1, %v990_v6  ;;  %1033 = vmatprep.subr.msk.bf16.mxu1 (!%p162_p10), %vm1276_vm1, %v990_v6  ;;  %v1014_v26 = vpack.c.bf16 (!%p162_p10), %v219_v25, %v218_v24  ;;  %v1020_v29 = vpack.c.bf16 (!%p162_p10), %v221_v28, %v220_v27  ;;  %v222_v30 = vld [vmem:[%s1551_s1 + $0x70] sm:$0xff] (!%p162_p10)  ;;  %v223_v31 = vld [vmem:[%s1551_s1 + $0x78] sm:$0xff] (!%p162_p10)  ;;  %v1425_v1 = vld [vmem:[%s1552_s2] ss:$0 sm:$0xff] (!%p162_p10) }
  0x14   : > { %v1026_v32 = vpack.c.bf16 (!%p162_p10), %v223_v31, %v222_v30 }
  0x16   : > { %s191_s7 = scalar_select %p190_p11, %s1176_s15, 1 }
  0x18   : > { %s854_s8 = sshll.u32 %s191_s7, 6  ;;  %s855_s7 = sshll.u32 %s1176_s15, 12 }
  0x19   : > { %s197_s11 = scalar_lea.vmem %s1550_s0, %s854_s8  ;;  %s713_s8 = sshll.u32 %s1431_s6, 4  ;;  %s1494_s8 = int_to_ptr.vmem [resolvable:$true] %s713_s8 }
  0x1a   : > { %v201_v8 = vld [vmem:[%s197_s11 + $0x8] sm:$0xff]  ;;  %v200_v9 = vld [vmem:[%s197_s11] sm:$0xff]  ;;  %v203_v11 = vld [vmem:[%s197_s11 + $0x18] sm:$0xff]  ;;  %995 = vmatpush3.bf16.xpose.msk.msra.mxu0 %vm1276_vm1, %v990_v6  ;;  %1041 = vmatpush3.bf16.xpose.msk.msra.mxu1 %vm1276_vm1, %v990_v6  ;;  %s1504_s15 = scalar_lea.sflag [#allocation3], %s186_s29  ;;  %s1106_s18 = scalar_lea.vmem %s1494_s8, 4096 }
  0x1b   : > { %263 = vxpose.xlu1.b32.start [1/4] (short) %v201_v8, 128  ;;  %231 = vxpose.xlu0.b32.start [1/4] (short) %v200_v9, 128  ;;  %v202_v12 = vld [vmem:[%s197_s11 + $0x10] sm:$0xff]  ;;  %v205_v14 = vld [vmem:[%s197_s11 + $0x28] sm:$0xff]  ;;  %v204_v15 = vld [vmem:[%s197_s11 + $0x20] sm:$0xff]  ;;  %p1107_p12 = scmp.ne.s32.totalorder %s1494_s8, %s1106_s18  ;;  %p1113_p1 = scmp.lt.s32.totalorder %s1494_s8, %s1111_s21 }
  0x1c   : > { %998 = vmatprep.subr.msk.bf16.mxu0 %vm1276_vm1, %v996_v13  ;;  %1034 = vmatprep.subr.msk.bf16.mxu1 %vm1276_vm1, %v996_v13  ;;  %v207_v18 = vld [vmem:[%s197_s11 + $0x38] sm:$0xff]  ;;  %v206_v19 = vld [vmem:[%s197_s11 + $0x30] sm:$0xff]  ;;  %s1492_s11 = scalar_lea.hbm %s1553_s3, %s855_s7  ;;  %p1114_p2 = scmp.lt.s32.totalorder %s1112_s23, %s1106_s18 }
  0x1d   : > { %p1108_p13 = pnand %p1107_p12, %p1249_p4 }
  0x1e   : > { %p1115_p3 = por %p1114_p2, %p1113_p1 }
  0x1f   : > { %264 = vxpose.xlu1.b32.cont [2/4] (short) %v203_v11, 128  ;;  %232 = vxpose.xlu0.b32.cont [2/4] (short) %v202_v12, 128  ;;  %p1109_p0 = pneg %p1108_p13 }
  0x21   : > { %p1116_p5 = pnand %p1115_p3, %p1109_p0 }
  0x22   : > { %1001 = vmatpush3.bf16.xpose.msk.msra.mxu0 %vm1276_vm1, %v996_v13  ;;  %1042 = vmatpush3.bf16.xpose.msk.msra.mxu1 %vm1276_vm1, %v996_v13 }
  0x23   : > { %265 = vxpose.xlu1.b32.cont [3/4] (short) %v205_v14, 128  ;;  %233 = vxpose.xlu0.b32.cont [3/4] (short) %v204_v15, 128 }
  0x24   : > { %1004 = vmatprep.subr.msk.bf16.mxu0 %vm1276_vm1, %v1002_v20  ;;  %1035 = vmatprep.subr.msk.bf16.mxu1 %vm1276_vm1, %v1002_v20 }
  0x27   : > { %266 = vxpose.xlu1.b32.end [4/4] (short) %v207_v18, 128  ;;  %234 = vxpose.xlu0.b32.end [4/4] (short) %v206_v19, 128 }
  0x2a   : > { %1007 = vmatpush3.bf16.xpose.msk.msra.mxu0 %vm1276_vm1, %v1002_v20  ;;  %1043 = vmatpush3.bf16.xpose.msk.msra.mxu1 %vm1276_vm1, %v1002_v20 }
  0x2b   : > { %1010 = vmatprep.subr.msk.bf16.mxu0 %vm1276_vm1, %v1008_v23  ;;  %1036 = vmatprep.subr.msk.bf16.mxu1 %vm1276_vm1, %v1008_v23 }
  0x32   : > { %1013 = vmatpush3.bf16.xpose.msk.msra.mxu0 %vm1276_vm1, %v1008_v23  ;;  %1044 = vmatpush3.bf16.xpose.msk.msra.mxu1 %vm1276_vm1, %v1008_v23 }
  0x33   : > { %1016 = vmatprep.subr.msk.bf16.mxu0 %vm1276_vm1, %v1014_v26  ;;  %1037 = vmatprep.subr.msk.bf16.mxu1 %vm1276_vm1, %v1014_v26 }
  0x3a   : > { %1019 = vmatpush3.bf16.xpose.msk.msra.mxu0 %vm1276_vm1, %v1014_v26  ;;  %1045 = vmatpush3.bf16.xpose.msk.msra.mxu1 %vm1276_vm1, %v1014_v26 }
  0x3b   : > { %1022 = vmatprep.subr.msk.bf16.mxu0 %vm1276_vm1, %v1020_v29  ;;  %1038 = vmatprep.subr.msk.bf16.mxu1 %vm1276_vm1, %v1020_v29 }
  0x42   : > { %1025 = vmatpush3.bf16.xpose.msk.msra.mxu0 %vm1276_vm1, %v1020_v29  ;;  %1046 = vmatpush3.bf16.xpose.msk.msra.mxu1 %vm1276_vm1, %v1020_v29 }
  0x43   : > { %1028 = vmatprep.subr.msk.bf16.mxu0 %vm1276_vm1, %v1026_v32  ;;  %1039 = vmatprep.subr.msk.bf16.mxu1 %vm1276_vm1, %v1026_v32 }
  0x4a   : > { %1031 = vmatpush3.bf16.xpose.msk.msra.mxu0 %vm1276_vm1, %v1026_v32  ;;  %1047 = vmatpush3.bf16.xpose.msk.msra.mxu1 %vm1276_vm1, %v1026_v32 }
  0x9b   : > { %v279_v33 = vpop.trf.xlu1  ;;  %v247_v34 = vpop.trf.xlu0 }
  0x9c   : > { %936 = vmatprep.mubr.msk.f32.mxu0 %vm295_vm0, %v247_v34  ;;  %960 = vmatprep.mubr.msk.f32.mxu1 %vm295_vm0, %v279_v33 }
  0x9f   : > { %v280_v35 = vpop.trf.xlu1  ;;  %v248_v36 = vpop.trf.xlu0 }
  0xa0   : > { %937 = vmatmul.mubr.msk.f32.vlgmr.msra.gmra.mrb[0].mxu0 %vm295_vm0, %v248_v36  ;;  %961 = vmatmul.mubr.msk.f32.vlgmr.msra.gmra.mrb[0].mxu1 %vm295_vm0, %v280_v35 }
  0xa3   : > { %v281_v37 = vpop.trf.xlu1  ;;  %v249_v38 = vpop.trf.xlu0 }
  0xa4   : > { %939 = vmatprep.mubr.msk.f32.mxu0 %vm295_vm0, %v249_v38  ;;  %963 = vmatprep.mubr.msk.f32.mxu1 %vm295_vm0, %v281_v37 }
  0xa7   : > { %v282_v39 = vpop.trf.xlu1  ;;  %v250_v40 = vpop.trf.xlu0 }
  0xa8   : > { %940 = vmatmul.mubr.msk.f32.gmra.mrb[2].mxu0 %vm295_vm0, %v250_v40  ;;  %964 = vmatmul.mubr.msk.f32.gmra.mrb[2].mxu1 %vm295_vm0, %v282_v39 }
  0xab   : > { %v283_v41 = vpop.trf.xlu1  ;;  %v251_v42 = vpop.trf.xlu0 }
  0xac   : > { %942 = vmatprep.mubr.msk.f32.mxu0 %vm295_vm0, %v251_v42  ;;  %966 = vmatprep.mubr.msk.f32.mxu1 %vm295_vm0, %v283_v41 }
  0xaf   : > { %v284_v43 = vpop.trf.xlu1  ;;  %v252_v44 = vpop.trf.xlu0 }
  0xb0   : > { %943 = vmatmul.mubr.msk.f32.gmra.mrb[4].mxu0 %vm295_vm0, %v252_v44  ;;  %967 = vmatmul.mubr.msk.f32.gmra.mrb[4].mxu1 %vm295_vm0, %v284_v43 }
  0xb3   : > { %v285_v45 = vpop.trf.xlu1  ;;  %v253_v46 = vpop.trf.xlu0 }
  0xb4   : > { %945 = vmatprep.mubr.msk.f32.mxu0 %vm295_vm0, %v253_v46  ;;  %969 = vmatprep.mubr.msk.f32.mxu1 %vm295_vm0, %v285_v45 }
  0xb7   : > { %v286_v47 = vpop.trf.xlu1  ;;  %v254_v48 = vpop.trf.xlu0 }
  0xb8   : > { %946 = vmatmul.mubr.msk.f32.gmra.mrb[6].mxu0 %vm295_vm0, %v254_v48  ;;  %970 = vmatmul.mubr.msk.f32.gmra.mrb[6].mxu1 %vm295_vm0, %v286_v47 }
  0xbb   : > { %v287_v49 = vpop.trf.xlu1  ;;  %v255_v50 = vpop.trf.xlu0 }
  0xbc   : > { %948 = vmatprep.mubr.msk.f32.mxu0 %vm295_vm0, %v255_v50  ;;  %972 = vmatprep.mubr.msk.f32.mxu1 %vm295_vm0, %v287_v49 }
  0xbf   : > { %v288_v51 = vpop.trf.xlu1  ;;  %v256_v52 = vpop.trf.xlu0 }
  0xc0   : > { %949 = vmatmul.mubr.msk.f32.gmra.mrb[8].mxu0 %vm295_vm0, %v256_v52  ;;  %973 = vmatmul.mubr.msk.f32.gmra.mrb[8].mxu1 %vm295_vm0, %v288_v51 }
  0xc3   : > { %v289_v53 = vpop.trf.xlu1  ;;  %v257_v54 = vpop.trf.xlu0 }
  0xc4   : > { %951 = vmatprep.mubr.msk.f32.mxu0 %vm295_vm0, %v257_v54  ;;  %975 = vmatprep.mubr.msk.f32.mxu1 %vm295_vm0, %v289_v53 }
  0xc7   : > { %v290_v55 = vpop.trf.xlu1  ;;  %v258_v56 = vpop.trf.xlu0 }
  0xc8   : > { %952 = vmatmul.mubr.msk.f32.gmra.mrb[10].mxu0 %vm295_vm0, %v258_v56  ;;  %976 = vmatmul.mubr.msk.f32.gmra.mrb[10].mxu1 %vm295_vm0, %v290_v55 }
  0xcb   : > { %v291_v57 = vpop.trf.xlu1  ;;  %v259_v58 = vpop.trf.xlu0 }
  0xcc   : > { %954 = vmatprep.mubr.msk.f32.mxu0 %vm295_vm0, %v259_v58  ;;  %978 = vmatprep.mubr.msk.f32.mxu1 %vm295_vm0, %v291_v57 }
  0xcf   : > { %v292_v59 = vpop.trf.xlu1  ;;  %v260_v60 = vpop.trf.xlu0 }
  0xd0   : > { %955 = vmatmul.mubr.msk.f32.gmra.mrb[12].mxu0 %vm295_vm0, %v260_v60  ;;  %979 = vmatmul.mubr.msk.f32.gmra.mrb[12].mxu1 %vm295_vm0, %v292_v59 }
  0xd3   : > { %v293_v61 = vpop.trf.xlu1  ;;  %v261_v62 = vpop.trf.xlu0 }
  0xd4   : > { %957 = vmatprep.mubr.msk.f32.mxu0 %vm295_vm0, %v261_v62  ;;  %981 = vmatprep.mubr.msk.f32.mxu1 %vm295_vm0, %v293_v61 }
  0xd7   : > { %v294_v63 = vpop.trf.xlu1  ;;  %v262_v0 = vpop.trf.xlu0 }
  0xd8   : > { %958 = vmatmul.mubr.msk.f32.gmra.mrb[14].mxu0 %vm295_vm0, %v262_v0  ;;  %982 = vmatmul.mubr.msk.f32.gmra.mrb[14].mxu1 %vm295_vm0, %v294_v63 }
 0x173   : > { %v938_v2 = vpop.f32.mrb[0].mxu0  ;;  %v962_v3 = vpop.f32.mrb[0].mxu1 }
 0x174   : > { %v512_v4 = vadd.f32 %v938_v2, %v1425_v1  ;;  %v592_v5 = vadd.f32 %v962_v3, %v1425_v1  ;;  %v506_v6 = vpop.f32.mrb[1].mxu0  ;;  %v586_v7 = vpop.f32.mrb[1].mxu1 }
 0x175   : > { %v507_v8 = vadd.f32 %v1425_v1, %v506_v6  ;;  %v587_v9 = vadd.f32 %v1425_v1, %v586_v7 }
 0x176   : > { %666 = vst [vmem:[%s1431_s6 + $0x8] sm:$0xff] %v512_v4  ;;  %682 = vst [vmem:[%s1431_s6 + $0x88] sm:$0xff] %v592_v5 }
 0x177   : > { %665 = vst [vmem:[%s1431_s6] sm:$0xff] %v507_v8  ;;  %681 = vst [vmem:[%s1431_s6 + $0x80] sm:$0xff] %v587_v9 }
 0x17b   : > { %v941_v10 = vpop.f32.mrb[2].mxu0  ;;  %v965_v11 = vpop.f32.mrb[2].mxu1 }
 0x17c   : > { %v522_v12 = vadd.f32 %v941_v10, %v1425_v1  ;;  %v602_v13 = vadd.f32 %v965_v11, %v1425_v1  ;;  %v516_v14 = vpop.f32.mrb[3].mxu0  ;;  %v596_v15 = vpop.f32.mrb[3].mxu1 }
 0x17d   : > { %v517_v16 = vadd.f32 %v1425_v1, %v516_v14  ;;  %v597_v17 = vadd.f32 %v1425_v1, %v596_v15 }
 0x17e   : > { %668 = vst [vmem:[%s1431_s6 + $0x18] sm:$0xff] %v522_v12  ;;  %684 = vst [vmem:[%s1431_s6 + $0x98] sm:$0xff] %v602_v13 }
 0x17f   : > { %667 = vst [vmem:[%s1431_s6 + $0x10] sm:$0xff] %v517_v16  ;;  %683 = vst [vmem:[%s1431_s6 + $0x90] sm:$0xff] %v597_v17 }
 0x183   : > { %v944_v18 = vpop.f32.mrb[4].mxu0  ;;  %v968_v19 = vpop.f32.mrb[4].mxu1 }
 0x184   : > { %v532_v20 = vadd.f32 %v944_v18, %v1425_v1  ;;  %v612_v21 = vadd.f32 %v968_v19, %v1425_v1  ;;  %v526_v22 = vpop.f32.mrb[5].mxu0  ;;  %v606_v23 = vpop.f32.mrb[5].mxu1 }
 0x185   : > { %v527_v24 = vadd.f32 %v1425_v1, %v526_v22  ;;  %v607_v25 = vadd.f32 %v1425_v1, %v606_v23 }
 0x186   : > { %670 = vst [vmem:[%s1431_s6 + $0x28] sm:$0xff] %v532_v20  ;;  %686 = vst [vmem:[%s1431_s6 + $0xa8] sm:$0xff] %v612_v21 }
 0x187   : > { %669 = vst [vmem:[%s1431_s6 + $0x20] sm:$0xff] %v527_v24  ;;  %685 = vst [vmem:[%s1431_s6 + $0xa0] sm:$0xff] %v607_v25 }
 0x18b   : > { %v947_v26 = vpop.f32.mrb[6].mxu0  ;;  %v971_v27 = vpop.f32.mrb[6].mxu1 }
 0x18c   : > { %v542_v28 = vadd.f32 %v947_v26, %v1425_v1  ;;  %v622_v29 = vadd.f32 %v971_v27, %v1425_v1  ;;  %v536_v30 = vpop.f32.mrb[7].mxu0  ;;  %v616_v31 = vpop.f32.mrb[7].mxu1 }
 0x18d   : > { %v537_v32 = vadd.f32 %v1425_v1, %v536_v30  ;;  %v617_v33 = vadd.f32 %v1425_v1, %v616_v31 }
 0x18e   : > { %672 = vst [vmem:[%s1431_s6 + $0x38] sm:$0xff] %v542_v28  ;;  %688 = vst [vmem:[%s1431_s6 + $0xb8] sm:$0xff] %v622_v29 }
 0x18f   : > { %671 = vst [vmem:[%s1431_s6 + $0x30] sm:$0xff] %v537_v32  ;;  %687 = vst [vmem:[%s1431_s6 + $0xb0] sm:$0xff] %v617_v33 }
 0x193   : > { %v950_v34 = vpop.f32.mrb[8].mxu0  ;;  %v974_v35 = vpop.f32.mrb[8].mxu1 }
 0x194   : > { %v552_v36 = vadd.f32 %v950_v34, %v1425_v1  ;;  %v632_v37 = vadd.f32 %v974_v35, %v1425_v1  ;;  %v546_v38 = vpop.f32.mrb[9].mxu0  ;;  %v626_v39 = vpop.f32.mrb[9].mxu1 }
 0x195   : > { %v547_v40 = vadd.f32 %v1425_v1, %v546_v38  ;;  %v627_v41 = vadd.f32 %v1425_v1, %v626_v39 }
 0x196   : > { %674 = vst [vmem:[%s1431_s6 + $0x48] sm:$0xff] %v552_v36  ;;  %690 = vst [vmem:[%s1431_s6 + $0xc8] sm:$0xff] %v632_v37 }
 0x197   : > { %673 = vst [vmem:[%s1431_s6 + $0x40] sm:$0xff] %v547_v40  ;;  %689 = vst [vmem:[%s1431_s6 + $0xc0] sm:$0xff] %v627_v41 }
 0x19b   : > { %v953_v42 = vpop.f32.mrb[10].mxu0  ;;  %v977_v43 = vpop.f32.mrb[10].mxu1 }
 0x19c   : > { %v562_v44 = vadd.f32 %v953_v42, %v1425_v1  ;;  %v642_v45 = vadd.f32 %v977_v43, %v1425_v1  ;;  %v556_v46 = vpop.f32.mrb[11].mxu0  ;;  %v636_v47 = vpop.f32.mrb[11].mxu1 }
 0x19d   : > { %v557_v48 = vadd.f32 %v1425_v1, %v556_v46  ;;  %v637_v49 = vadd.f32 %v1425_v1, %v636_v47 }
 0x19e   : > { %676 = vst [vmem:[%s1431_s6 + $0x58] sm:$0xff] %v562_v44  ;;  %692 = vst [vmem:[%s1431_s6 + $0xd8] sm:$0xff] %v642_v45 }
 0x19f   : > { %675 = vst [vmem:[%s1431_s6 + $0x50] sm:$0xff] %v557_v48  ;;  %691 = vst [vmem:[%s1431_s6 + $0xd0] sm:$0xff] %v637_v49 }
 0x1a3   : > { %v956_v50 = vpop.f32.mrb[12].mxu0  ;;  %v980_v51 = vpop.f32.mrb[12].mxu1 }
 0x1a4   : > { %v572_v52 = vadd.f32 %v956_v50, %v1425_v1  ;;  %v652_v53 = vadd.f32 %v980_v51, %v1425_v1  ;;  %v566_v54 = vpop.f32.mrb[13].mxu0  ;;  %v646_v55 = vpop.f32.mrb[13].mxu1 }
 0x1a5   : > { %v567_v56 = vadd.f32 %v1425_v1, %v566_v54  ;;  %v647_v57 = vadd.f32 %v1425_v1, %v646_v55 }
 0x1a6   : > { %678 = vst [vmem:[%s1431_s6 + $0x68] sm:$0xff] %v572_v52  ;;  %694 = vst [vmem:[%s1431_s6 + $0xe8] sm:$0xff] %v652_v53 }
 0x1a7   : > { %677 = vst [vmem:[%s1431_s6 + $0x60] sm:$0xff] %v567_v56  ;;  %693 = vst [vmem:[%s1431_s6 + $0xe0] sm:$0xff] %v647_v57 }
 0x1ab   : > { %v959_v58 = vpop.f32.mrb[14].mxu0  ;;  %v983_v59 = vpop.f32.mrb[14].mxu1 }
 0x1ac   : > { %v582_v60 = vadd.f32 %v959_v58, %v1425_v1  ;;  %v662_v61 = vadd.f32 %v983_v59, %v1425_v1  ;;  %v576_v62 = vpop.f32.mrb[15].mxu0  ;;  %v656_v63 = vpop.f32.mrb[15].mxu1 }
 0x1ad   : > { %v577_v0 = vadd.f32 %v1425_v1, %v576_v62  ;;  %v657_v2 = vadd.f32 %v1425_v1, %v656_v63 }
 0x1ae   : > { %680 = vst [vmem:[%s1431_s6 + $0x78] sm:$0xff] %v582_v60  ;;  %696 = vst [vmem:[%s1431_s6 + $0xf8] sm:$0xff] %v662_v61 }
 0x1af   : > { %679 = vst [vmem:[%s1431_s6 + $0x70] sm:$0xff] %v577_v0  ;;  %695 = vst [vmem:[%s1431_s6 + $0xf0] sm:$0xff] %v657_v2 }
 0x1b0   : > { %1119 = shalt.err (!%p1116_p5)
}
 0x1b1   : > { %s1120_s26 = scalar_lea.hbm %s1492_s11, 4096  ;;  %s1124_s29 = scalar_lea.hbm %s1553_s3, 8192 }
 0x1b2   : > { %p1121_p6 = scmp.ne.s32.totalorder %s1492_s11, %s1120_s26  ;;  %p1125_p10 = scmp.lt.u32.totalorder %s1492_s11, %s1553_s3 }
 0x1b3   : > { %p1126_p11 = scmp.lt.u32.totalorder %s1124_s29, %s1120_s26  ;;  %p1128_p13 = scmp.lt.u32.totalorder %s1120_s26, %s1492_s11 }
 0x1b4   : > { %p1122_p7 = pnand %p1121_p6, %p1249_p4 }
 0x1b5   : > { %p1127_p12 = por %p1126_p11, %p1125_p10 }
 0x1b6   : > { %p1123_p9 = pneg %p1122_p7 }
 0x1b7   : > { %p1129_p0 = por %p1128_p13, %p1127_p12 }
 0x1b9   : > { %p1130_p1 = pnand %p1129_p0, %p1123_p9 }
 0x1bb   : > { %1133 = shalt.err (!%p1130_p1)
}
 0x1bc   : > { %s1187_s5 = smov 128   ;;  %s1188_s6 = smov 8  }
 0x1bd   : > { %1048 = dma.vmem_to_hbm [thread:$0]  (%p1249_p4), %s1494_s8, 4096, %s1492_s11, %s1504_s15, %s1187_s5, %s1187_s5, %s1188_s6  }
 0x1be PF: > { %p1054_p2 = scmp.ge.s32.totalorder %s1184_s17, 2  ;;  %s728_s7 = sand.u32 1, %s1164_s12  }
 0x1bf   : > { %s729_s9 = scalar_lea.sflag [#allocation3], %s728_s7 }
 0x1c0   : > { %p1051_p3 = pnand %p1054_p2, %p1256_p8 }
 0x1c2   : > { %1159 = dma.done.wait (!%p1051_p3), %s729_s9, 4096  }
 0x1c3   : > { %1161 = vsyncadd (!%p1051_p3), %s729_s9, 4294963200  ;;  %s16_s17 = sadd.s32 1, %s1184_s17   ;;  %s1558_s12 = smov %s1168_s13 }
 0x1c4   : > { %p13_p5 = scmp.ge.s32.totalorder %s16_s17, 4   ;;  %s1559_s13 = smov %s1172_s14 }
 0x1c5   : > { %s1560_s14 = smov %s1262_s25  ;;  %s1561_s15 = smov %s1180_s16 }
 0x1c6   : > { %s1562_s16 = smov %s1564_s20  ;;  %15 = sbr.rel (!%p13_p5) target bundleno = 4 (0x4), region = 67 }
 0x1cd   :  { %734 = vsyncpa [#allocation3], 1 }
 0x1ce   :  { %736 = vsyncpa [#allocation3 + $0x1], 1 }

</bundles_post_ra>
